<compile_context>
chip_gen: v5e
topology: v5e:2x2
jax: 0.10.0
libtpu: 0.0.40
codegen_flags: <defaults>
</compile_context>

<pallas_src>
import math

import jax
import jax.numpy as jnp
from jax.experimental import pallas as pl
from jax.experimental.pallas import tpu as pltpu


_MAX_THW = 8192  # cap on pooling-tile lanes (keeps the unrolled add loop <=64)


def _round_up(n, m):
    return ((n + m - 1) // m) * m


def _physical_vmem_bytes():
    """Best-effort physical VMEM query; conservative (v7x-sized) fallback."""
    try:
        info = pltpu.get_tpu_info()
        cap = getattr(info, "vmem_capacity_bytes", None)
        if cap:
            return int(cap)
    except Exception:
        pass
    return 64 * 1024 * 1024


def _choose_tiles(B, C, HW, itemsize, x_budget, allow_opportunistic_split):
    """Pick (batches per block, pooling-tile lane width)."""
    HWp = _round_up(HW, 128)
    max_thw = min(HWp, _MAX_THW)
    sub = {4: 8, 2: 16, 1: 32}.get(itemsize, 8)

    def thw_for(rows):
        t = (x_budget // (2 * rows * itemsize)) // 128 * 128
        return max(min(t, max_thw), 128)

    def fits(rows, t):
        return 2 * rows * t * itemsize <= x_budget

    # Valid batch-chunk sizes: tb must divide B, and both the x-block rows
    # (tb*C) and the output-block rows (tb) must satisfy the sublane rule.
    cands = [tb for tb in range(B, 0, -1)
             if B % tb == 0
             and (tb == B or (tb % 8 == 0 and (tb * C) % sub == 0))]

    target = min(512, max_thw)  # want >=512-lane pooling tiles when possible
    tb_sel = None
    thw_sel = None
    for tb in cands:            # largest chunk first: split batches only if needed
        t = thw_for(tb * C)
        if fits(tb * C, t) and t >= target:
            tb_sel, thw_sel = tb, t
            break
    if tb_sel is None:          # nothing reaches the target: smallest valid chunk
        tb_sel = cands[-1]
        thw_sel = thw_for(tb_sel * C)

    # Opportunistic batch split (small-VMEM / 2-TensorCore chips): keep it only
    # if every grid step still moves a healthy (>=8 MiB) x block.
    if allow_opportunistic_split and tb_sel == B:
        for tb in cands:
            if tb < B and tb * C * thw_sel * itemsize >= 8 * 1024 * 1024:
                tb_sel = tb
                break
    return tb_sel, thw_sel


def _make_kernel(C, TB, THW, HW, acc_lanes):
    TR = TB * C
    n_slices = THW // 128
    phases = acc_lanes // 128
    ragged = (HW % THW) != 0

    def kernel(x_ref, w1_ref, w2_ref, b2_ref, o_ref, acc_ref):
        # x_ref : (TR, THW)      native dtype (f32 or bf16), rows = tb*C_in
        # w1_ref: (C, H1p)       f32, 1/HW folded in, zero-padded columns
        # w2_ref: (H1p, Cp)      f32, zero-padded
        # b2_ref: (1, Cp)        f32, zero-padded
        # o_ref : (TB, Cp)       f32 lane-dense output block
        # acc_ref: (TR, acc_lanes) f32 scratch, persists across the HW grid
        k = pl.program_id(1)

        @pl.when(k == 0)
        def _init():
            acc_ref[...] = jnp.zeros_like(acc_ref)

        # Elementwise (VPU) accumulation of raw spatial sums; per-vreg upcast,
        # masked ragged tail, multiple accumulator phases break the add chain.
        if ragged:
            lane = jax.lax.broadcasted_iota(jnp.int32, (TR, 128), 1)
            rem = HW - k * THW
        for j in range(n_slices):
            xj = x_ref[:, j * 128:(j + 1) * 128].astype(jnp.float32)
            if ragged:
                xj = jnp.where(lane < rem - j * 128, xj, 0.0)
            col = (j % phases) * 128
            acc_ref[:, col:col + 128] += xj

        @pl.when(k == pl.num_programs(1) - 1)
        def _finish():
            ones_row = jnp.ones((1, acc_lanes), jnp.float32)
            w1 = w1_ref[...]
            w2 = w2_ref[...]
            b2 = b2_ref[...]
            for b in range(TB):
                # Lane-reduce + lay this image's pooled sums out as a (1, C)
                # row in one MXU contraction (no in-kernel reshape needed).
                pooled = jax.lax.dot_general(
                    ones_row, acc_ref[b * C:(b + 1) * C, :],
                    (((1,), (1,)), ((), ())),
                    preferred_element_type=jnp.float32)           # (1, C)
                # Linear(C_in -> H1, bias=False) + ReLU (padded cols stay 0).
                h = jnp.maximum(
                    jnp.dot(pooled, w1, preferred_element_type=jnp.float32),
                    0.0)                                           # (1, H1p)
                # Linear(H1 -> C_out, bias=True), then tanh, then relu.
                m = jnp.dot(h, w2, preferred_element_type=jnp.float32) + b2
                m = jnp.maximum(jnp.tanh(m), 0.0)                  # (1, Cp)
                o_ref[pl.ds(b, 1), :] = m.astype(o_ref.dtype)

    return kernel


def mask_generator_contra_forward(x_nchw, w1, w2, b2, *, x_budget_bytes=None):
    """x_nchw: (B, C_in, H, W) [f32 or bf16]; w1: (C_in, H1); w2: (H1, C_out);
    b2: (C_out,).  Weights are stored transposed (in, out) vs. PyTorch."""
    B, C, H, W = x_nchw.shape
    HW = H * W
    H1 = w1.shape[1]
    C_out = w2.shape[1]

    # Flatten B*C_in into the sublane axis: dense vregs / VMEM / DMA rows.
    x2 = x_nchw.reshape(B * C, HW)
    itemsize = jnp.dtype(x2.dtype).itemsize

    # Lane-pad the small hidden/output dims to 128 (unmasked stores, clean MXU
    # tiles) and fold the 1/HW pooling scale into w1 (one-time, tiny).
    H1p = _round_up(H1, 128)
    Cp = _round_up(C_out, 128)
    w1p = jnp.zeros((C, H1p), jnp.float32).at[:, :H1].set(
        w1.astype(jnp.float32) / HW)
    w2p = jnp.zeros((H1p, Cp), jnp.float32).at[:H1, :C_out].set(
        w2.astype(jnp.float32))
    b2p = jnp.zeros((1, Cp), jnp.float32).at[0, :C_out].set(
        b2.astype(jnp.float32))

    # Chip-keyed VMEM budgets: v5e/v6e have 128 MiB physical VMEM, v7x only 64.
    phys_vmem = _physical_vmem_bytes()
    big_vmem = phys_vmem >= 100 * 1024 * 1024
    default_budget = (48 if big_vmem else 20) * 1024 * 1024
    vmem_cap = (64 if big_vmem else 32) * 1024 * 1024
    x_budget = default_budget if x_budget_bytes is None else int(x_budget_bytes)

    TB, THW = _choose_tiles(B, C, HW, itemsize, x_budget,
                            allow_opportunistic_split=not big_vmem)
    TR = TB * C
    acc_lanes = min(THW, 512 if TR < 64 else 128)
    grid = (B // TB, pl.cdiv(HW, THW))

    kernel = _make_kernel(C=C, TB=TB, THW=THW, HW=HW, acc_lanes=acc_lanes)

    x_block_bytes = TR * THW * itemsize
    w_bytes = 4 * (w1p.size + w2p.size + b2p.size)
    need = (2 * x_block_bytes + 2 * w_bytes + TR * acc_lanes * 4
            + 2 * TB * Cp * 4 + (2 << 20))
    vmem_limit = int(min(max(need, 8 << 20), vmem_cap))

    flops = (2 * B * C * HW + 2 * B * C * acc_lanes
             + 2 * B * C * H1p + 2 * B * H1p * Cp)
    bytes_accessed = B * C * HW * itemsize + w_bytes + B * Cp * 4

    out_padded = pl.pallas_call(
        kernel,
        out_shape=jax.ShapeDtypeStruct((B, Cp), jnp.float32),
        grid_spec=pltpu.PrefetchScalarGridSpec(
            num_scalar_prefetch=0,
            grid=grid,
            in_specs=[
                # x: tiled over (batch chunk, pooling tile); double-buffered.
                pl.BlockSpec((TR, THW), lambda b, k: (b, k)),
                # Weights / bias: full blocks, resident across the grid.
                pl.BlockSpec((C, H1p), lambda b, k: (0, 0)),
                pl.BlockSpec((H1p, Cp), lambda b, k: (0, 0)),
                pl.BlockSpec((1, Cp), lambda b, k: (0, 0)),
            ],
            out_specs=pl.BlockSpec((TB, Cp), lambda b, k: (b, 0)),
            scratch_shapes=[pltpu.VMEM((TR, acc_lanes), jnp.float32)],
        ),
        compiler_params=pltpu.CompilerParams(
            # batch chunks are independent (megacore on v7x); HW is a reduction.
            dimension_semantics=("parallel", "arbitrary"),
            vmem_limit_bytes=vmem_limit,
        ),
        cost_estimate=pl.CostEstimate(
            flops=int(flops),
            transcendentals=int(B * Cp),
            bytes_accessed=int(bytes_accessed),
        ),
    )(x2, w1p, w2p, b2p)

    return out_padded[:, :C_out]


def _reference_forward(x_nchw, w1, w2, b2):
    pooled = jnp.mean(x_nchw.astype(jnp.float32), axis=(2, 3))
    h = jnp.maximum(pooled @ w1, 0.0)
    m = h @ w2 + b2[None, :]
    return jnp.maximum(jnp.tanh(m), 0.0)


def _make_case(key, B, C_in, H, W, C_out, x_dtype):
    H1 = C_out if C_out < 128 else C_out // 2
    kx, k1, k2 = jax.random.split(key, 3)
    x = jax.random.normal(kx, (B, C_in, H, W), dtype=jnp.float32).astype(x_dtype)
    # Kaiming-normal statistics (fan_in, gain=sqrt(2)); weights stored (in, out).
    w1 = jax.random.normal(k1, (C_in, H1), dtype=jnp.float32) * math.sqrt(2.0 / C_in)
    w2 = jax.random.normal(k2, (H1, C_out), dtype=jnp.float32) * math.sqrt(2.0 / H1)
    b2 = jnp.ones((C_out,), dtype=jnp.float32)  # nn.init.constant_(bias, 1.0)
    return x, w1, w2, b2


if __name__ == "__main__":
    key = jax.random.PRNGKey(0)
    cases = [
        # (B, C_in, H, W, C_out, x dtype, atol, forced x budget)
        (2, 4, 16, 16, 8, jnp.float32, 1e-4, None),       # spec-sized, single tile
        (2, 4, 7, 7, 8, jnp.float32, 1e-4, None),         # HW=49 < 128 -> masked tail
        (2, 4, 56, 56, 8, jnp.bfloat16, 1e-3, None),      # bf16 x, ragged HW=3136
        (4, 16, 16, 16, 128, jnp.float32, 1e-4, None),    # C_out>=128 -> H1=C_out//2
        (16, 8, 28, 28, 8, jnp.float32, 1e-4, 256 * 1024),  # tiny budget -> batch
        #   chunking + multi-tile pooling grid + ragged tail, all exercised.
    ]
    for i, (B, C_in, H, W, C_out, xdt, atol, budget) in enumerate(cases):
        key, sub = jax.random.split(key)
        x, w1, w2, b2 = _make_case(sub, B, C_in, H, W, C_out, xdt)
        out = jax.block_until_ready(
            mask_generator_contra_forward(x, w1, w2, b2, x_budget_bytes=budget))
        ref = _reference_forward(x, w1, w2, b2)
        assert out.shape == (B, C_out), (i, out.shape)
        err = float(jnp.max(jnp.abs(out - ref)))
        assert err <= atol, (i, err)
    print("KERNEL_OK")
</pallas_src>

<mosaic_0001>
module attributes {stable_mosaic.version = 11 : i64} {
  func.func @kernel(%arg0: i32, %arg1: i32, %arg2: memref<8x256xf32, #tpu.memory_space<vmem>>, %arg3: memref<4x128xf32, #tpu.memory_space<vmem>>, %arg4: memref<128x128xf32, #tpu.memory_space<vmem>>, %arg5: memref<1x128xf32, #tpu.memory_space<vmem>>, %arg6: memref<2x128xf32, #tpu.memory_space<vmem>>, %arg7: memref<8x256xf32, #tpu.memory_space<vmem>>) attributes {dimension_semantics = [#tpu.dimension_semantics<parallel>, #tpu.dimension_semantics<arbitrary>], iteration_bounds = array<i64: 1, 1>, scalar_prefetch = 0 : i64, scratch_operands = 1 : i64, tpu.core_type = #tpu.core_type<tc>, window_params = [{transform_indices = @transform_0, window_bounds = array<i64: 8, 256>}, {pipeline_mode = #tpu.pipeline_mode<synchronous>, transform_indices = @transform_1, window_bounds = array<i64: 4, 128>}, {pipeline_mode = #tpu.pipeline_mode<synchronous>, transform_indices = @transform_2, window_bounds = array<i64: 128, 128>}, {pipeline_mode = #tpu.pipeline_mode<synchronous>, transform_indices = @transform_3, window_bounds = array<i64: 1, 128>}, {transform_indices = @transform_4, window_bounds = array<i64: 2, 128>}]} {
    %c0_i32 = arith.constant 0 : i32
    %0 = arith.cmpi eq, %arg1, %c0_i32 : i32
    %1 = arith.extui %0 : i1 to i32
    %c0_i32_0 = arith.constant 0 : i32
    %2 = arith.cmpi ne, %1, %c0_i32_0 : i32
    scf.if %2 {
      %cst = arith.constant 0.000000e+00 : f32
      %14 = vector.broadcast %cst : f32 to vector<8x256xf32>
      %c0_13 = arith.constant 0 : index
      %c0_14 = arith.constant 0 : index
      %15 = vector.load %arg7[%c0_13, %c0_14] : memref<8x256xf32, #tpu.memory_space<vmem>>, vector<8x256xf32>
      tpu.vector_store %arg7[%c0_13, %c0_14], %14 {strides = array<i32>} : memref<8x256xf32, #tpu.memory_space<vmem>>, vector<8x256xf32>,
    } else {
    }
    %c0 = arith.constant 0 : index
    %c0_1 = arith.constant 0 : index
    %3 = vector.load %arg2[%c0, %c0_1] : memref<8x256xf32, #tpu.memory_space<vmem>>, vector<8x128xf32>
    %c0_2 = arith.constant 0 : index
    %c0_3 = arith.constant 0 : index
    %4 = vector.load %arg7[%c0_2, %c0_3] : memref<8x256xf32, #tpu.memory_space<vmem>>, vector<8x128xf32>
    %5 = arith.addf %4, %3 : vector<8x128xf32>
    %c0_4 = arith.constant 0 : index
    %c0_5 = arith.constant 0 : index
    %6 = vector.load %arg7[%c0_4, %c0_5] : memref<8x256xf32, #tpu.memory_space<vmem>>, vector<8x128xf32>
    tpu.vector_store %arg7[%c0_4, %c0_5], %5 {strides = array<i32>} : memref<8x256xf32, #tpu.memory_space<vmem>>, vector<8x128xf32>,
    %c0_6 = arith.constant 0 : index
    %c128 = arith.constant 128 : index
    %7 = vector.load %arg2[%c0_6, %c128] : memref<8x256xf32, #tpu.memory_space<vmem>>, vector<8x128xf32>
    %c0_7 = arith.constant 0 : index
    %c128_8 = arith.constant 128 : index
    %8 = vector.load %arg7[%c0_7, %c128_8] : memref<8x256xf32, #tpu.memory_space<vmem>>, vector<8x128xf32>
    %9 = arith.addf %8, %7 : vector<8x128xf32>
    %c0_9 = arith.constant 0 : index
    %c128_10 = arith.constant 128 : index
    %10 = vector.load %arg7[%c0_9, %c128_10] : memref<8x256xf32, #tpu.memory_space<vmem>>, vector<8x128xf32>
    tpu.vector_store %arg7[%c0_9, %c128_10], %9 {strides = array<i32>} : memref<8x256xf32, #tpu.memory_space<vmem>>, vector<8x128xf32>,
    %c0_i32_11 = arith.constant 0 : i32
    %11 = arith.cmpi eq, %arg1, %c0_i32_11 : i32
    %12 = arith.extui %11 : i1 to i32
    %c0_i32_12 = arith.constant 0 : i32
    %13 = arith.cmpi ne, %12, %c0_i32_12 : i32
    scf.if %13 {
      %cst = arith.constant 1.000000e+00 : f32
      %14 = vector.broadcast %cst : f32 to vector<1x256xf32>
      %c0_13 = arith.constant 0 : index
      %c0_14 = arith.constant 0 : index
      %15 = vector.load %arg3[%c0_13, %c0_14] : memref<4x128xf32, #tpu.memory_space<vmem>>, vector<4x128xf32>
      %c0_15 = arith.constant 0 : index
      %c0_16 = arith.constant 0 : index
      %16 = vector.load %arg4[%c0_15, %c0_16] : memref<128x128xf32, #tpu.memory_space<vmem>>, vector<128x128xf32>
      %c0_17 = arith.constant 0 : index
      %c0_18 = arith.constant 0 : index
      %17 = vector.load %arg5[%c0_17, %c0_18] : memref<1x128xf32, #tpu.memory_space<vmem>>, vector<1x128xf32>
      %c0_19 = arith.constant 0 : index
      %c0_20 = arith.constant 0 : index
      %18 = vector.load %arg7[%c0_19, %c0_20] : memref<8x256xf32, #tpu.memory_space<vmem>>, vector<4x256xf32>
      %cst_21 = arith.constant dense<0.000000e+00> : vector<1x4xf32>
      %19 = tpu.matmul %14, %18, %cst_21 {dimension_numbers = #tpu.dot_dimension_numbers<[1], [1], [0], [0], [0, 0, 1, 0], [], []>} : vector<1x256xf32>, vector<4x256xf32>, vector<1x4xf32> -> vector<1x4xf32>
      %cst_22 = arith.constant dense<0.000000e+00> : vector<1x128xf32>
      %20 = tpu.matmul %19, %15, %cst_22 {dimension_numbers = #tpu.dot_dimension_numbers<[1], [0], [0], [1], [0, 0, 1, 1], [], []>} : vector<1x4xf32>, vector<4x128xf32>, vector<1x128xf32> -> vector<1x128xf32>
      %cst_23 = arith.constant 0.000000e+00 : f32
      %21 = vector.broadcast %cst_23 : f32 to vector<1x128xf32>
      %22 = arith.maximumf %20, %21 : vector<1x128xf32>
      %cst_24 = arith.constant dense<0.000000e+00> : vector<1x128xf32>
      %23 = tpu.matmul %22, %16, %cst_24 {dimension_numbers = #tpu.dot_dimension_numbers<[1], [0], [0], [1], [0, 0, 1, 1], [], []>} : vector<1x128xf32>, vector<128x128xf32>, vector<1x128xf32> -> vector<1x128xf32>
      %24 = arith.addf %23, %17 : vector<1x128xf32>
      %25 = math.tanh %24 : vector<1x128xf32>
      %cst_25 = arith.constant 0.000000e+00 : f32
      %26 = vector.broadcast %cst_25 : f32 to vector<1x128xf32>
      %27 = arith.maximumf %25, %26 : vector<1x128xf32>
      %c0_26 = arith.constant 0 : index
      %c0_27 = arith.constant 0 : index
      %28 = vector.load %arg6[%c0_26, %c0_27] : memref<2x128xf32, #tpu.memory_space<vmem>>, vector<1x128xf32>
      tpu.vector_store %arg6[%c0_26, %c0_27], %27 {strides = array<i32>} : memref<2x128xf32, #tpu.memory_space<vmem>>, vector<1x128xf32>,
      %c4 = arith.constant 4 : index
      %c0_28 = arith.constant 0 : index
      %29 = vector.load %arg7[%c4, %c0_28] : memref<8x256xf32, #tpu.memory_space<vmem>>, vector<4x256xf32>
      %cst_29 = arith.constant dense<0.000000e+00> : vector<1x4xf32>
      %30 = tpu.matmul %14, %29, %cst_29 {dimension_numbers = #tpu.dot_dimension_numbers<[1], [1], [0], [0], [0, 0, 1, 0], [], []>} : vector<1x256xf32>, vector<4x256xf32>, vector<1x4xf32> -> vector<1x4xf32>
      %cst_30 = arith.constant dense<0.000000e+00> : vector<1x128xf32>
      %31 = tpu.matmul %30, %15, %cst_30 {dimension_numbers = #tpu.dot_dimension_numbers<[1], [0], [0], [1], [0, 0, 1, 1], [], []>} : vector<1x4xf32>, vector<4x128xf32>, vector<1x128xf32> -> vector<1x128xf32>
      %cst_31 = arith.constant 0.000000e+00 : f32
      %32 = vector.broadcast %cst_31 : f32 to vector<1x128xf32>
      %33 = arith.maximumf %31, %32 : vector<1x128xf32>
      %cst_32 = arith.constant dense<0.000000e+00> : vector<1x128xf32>
      %34 = tpu.matmul %33, %16, %cst_32 {dimension_numbers = #tpu.dot_dimension_numbers<[1], [0], [0], [1], [0, 0, 1, 1], [], []>} : vector<1x128xf32>, vector<128x128xf32>, vector<1x128xf32> -> vector<1x128xf32>
      %35 = arith.addf %34, %17 : vector<1x128xf32>
      %36 = math.tanh %35 : vector<1x128xf32>
      %cst_33 = arith.constant 0.000000e+00 : f32
      %37 = vector.broadcast %cst_33 : f32 to vector<1x128xf32>
      %38 = arith.maximumf %36, %37 : vector<1x128xf32>
      %c1 = arith.constant 1 : index
      %c0_34 = arith.constant 0 : index
      %39 = vector.load %arg6[%c1, %c0_34] : memref<2x128xf32, #tpu.memory_space<vmem>>, vector<1x128xf32>
      tpu.vector_store %arg6[%c1, %c0_34], %38 {strides = array<i32>} : memref<2x128xf32, #tpu.memory_space<vmem>>, vector<1x128xf32>,
    } else {
    }
    return
  }
  func.func @transform_0(%arg0: i32, %arg1: i32) -> (i32, i32) {
    %c0_i32 = arith.constant 0 : i32
    return %arg0, %arg1 : i32, i32
  }
  func.func @transform_1(%arg0: i32, %arg1: i32) -> (i32, i32) {
    %c0_i32 = arith.constant 0 : i32
    %c0_i32_0 = arith.constant 0 : i32
    %c0_i32_1 = arith.constant 0 : i32
    return %c0_i32, %c0_i32_0 : i32, i32
  }
  func.func @transform_2(%arg0: i32, %arg1: i32) -> (i32, i32) {
    %c0_i32 = arith.constant 0 : i32
    %c0_i32_0 = arith.constant 0 : i32
    %c0_i32_1 = arith.constant 0 : i32
    return %c0_i32, %c0_i32_0 : i32, i32
  }
  func.func @transform_3(%arg0: i32, %arg1: i32) -> (i32, i32) {
    %c0_i32 = arith.constant 0 : i32
    %c0_i32_0 = arith.constant 0 : i32
    %c0_i32_1 = arith.constant 0 : i32
    return %c0_i32, %c0_i32_0 : i32, i32
  }
  func.func @transform_4(%arg0: i32, %arg1: i32) -> (i32, i32) {
    %c0_i32 = arith.constant 0 : i32
    %c0_i32_0 = arith.constant 0 : i32
    return %arg0, %c0_i32 : i32, i32
  }
}

</mosaic_0001>

<bundles_post_ra>
// kernel: tpu_custom_call.1
= control target key start
LH: loop header
LB: loop body
LE: loop exit
PB: predicated region body
PF: predicated region fallthrough
CT: control target
= control target key end

     0   :  { %9 = vsyncpa [#allocation4], 0  ;;  %s470_s0 = inlined_call_operand.hbm [shape: f32[8,256], index: 0, kind: input, shape index: {}]   ;;  %s471_s1 = inlined_call_operand.hbm [shape: f32[4,128], index: 1, kind: input, shape index: {}]   ;;  %s472_s2 = inlined_call_operand.hbm [shape: f32[128,128], index: 2, kind: input, shape index: {}]   ;;  %s473_s3 = inlined_call_operand.vmem [shape: f32[1,128], index: 3, kind: input, shape index: {}]   ;;  %s474_s4 = inlined_call_operand.hbm [shape: f32[2,128], index: 4, kind: output, shape index: {}]  }
   0x1   :  { %10 = vsyncpa [#allocation7], 0  ;;  %s28_s17 = sshll.u32 %s471_s1, 4  ;;  %s29_s17 = int_to_ptr.hbm [resolvable:$true] %s28_s17 }
   0x2   :  { %11 = vsyncpa [#allocation5], 0  ;;  %s421_s18 = smov [#allocation6]   ;;  %s17_s22 = sshll.u32 %s470_s0, 4  ;;  %s18_s22 = int_to_ptr.hbm [resolvable:$true] %s17_s22 }
   0x3   :  { %s30_s19 = sshll.u32 %s421_s18, 4  ;;  %s422_s23 = smov [#allocation3]   ;;  %s31_s19 = int_to_ptr.vmem [resolvable:$true] %s30_s19 }
   0x4   :  { %33 = dma.hbm_to_vmem [thread:$0]  %s29_s17, 64, %s31_s19, [#allocation7]  }
   0x5   :  { %s19_s24 = sshll.u32 %s422_s23, 4  ;;  %s38_s27 = sshll.u32 %s472_s2, 4  ;;  %s20_s24 = int_to_ptr.vmem [resolvable:$true] %s19_s24  ;;  %s39_s27 = int_to_ptr.hbm [resolvable:$true] %s38_s27 }
   0x6   :  { %22 = dma.hbm_to_vmem [thread:$0]  %s18_s22, 256, %s20_s24, [#allocation4]  }
   0x7   :  { %s423_s1 = smov [#allocation8]   ;;  %s424_s29 = smov 128  }
   0x8   :  { %s40_s28 = sshll.u32 %s423_s1, 4  ;;  %s425_s30 = smov 8   ;;  %s41_s28 = int_to_ptr.vmem [resolvable:$true] %s40_s28 }
   0x9   :  { %46 = dma.hbm_to_vmem [thread:$0]  %s39_s27, 2048, %s41_s28, [#allocation7], %s424_s29, %s424_s29, %s425_s30  }
   0xa   :  { %415 = dma.done.wait [#allocation4], 256  }
   0xb   :  { %416 = vsyncadd [#allocation4], 4294967040 }
   0xc   :  { %417 = dma.done.wait [#allocation7], 2112  }
   0xd   :  { %418 = vsyncadd [#allocation7], 4294965184  ;;  %v67_v0 = vld [vmem:[#allocation3] sm:$0xff]  ;;  %v71_v1 = vld [vmem:[#allocation3 + $0x8] sm:$0xff]  ;;  %v426_v8 = vmov 1.0   ;;  %vm142_vm0 = vcmask 1043456  }
   0xe   :  { %70 = vst [vmem:[#allocation2] sm:$0xff] %v67_v0  ;;  %v78_v9 = vld [vmem:[#allocation6] sm:$0xf]  ;;  %v93_v11 = vld [vmem:[#allocation8 + $0x70] sm:$0xff]  ;;  %v92_v12 = vld [vmem:[#allocation8 + $0x68] sm:$0xff]  ;;  %vm138_vm1 = vcmask 31744  }
   0xf   :  { %74 = vst [vmem:[#allocation2 + $0x8] sm:$0xff] %v71_v1  ;;  %v94_v10 = vld [vmem:[#allocation8 + $0x78] sm:$0xff]  ;;  %v91_v13 = vld [vmem:[#allocation8 + $0x60] sm:$0xff]  ;;  %v89_v15 = vld [vmem:[#allocation8 + $0x50] sm:$0xff]  ;;  %s427_s5 = smov [#allocation9]   ;;  %s292_s9 = sshll.u32 %s474_s4, 4  ;;  %s293_s9 = int_to_ptr.hbm [resolvable:$true] %s292_s9 }
  0x10   :  { %167 = vmatpush.msra.mxu3 %v94_v10  ;;  %262 = vmatpush.msra.mxu2 %v94_v10  ;;  %v90_v14 = vld [vmem:[#allocation8 + $0x58] sm:$0xff]  ;;  %v88_v16 = vld [vmem:[#allocation8 + $0x48] sm:$0xff]  ;;  %v87_v17 = vld [vmem:[#allocation8 + $0x40] sm:$0xff]  ;;  %s290_s6 = sshll.u32 %s427_s5, 4  ;;  %s291_s6 = int_to_ptr.vmem [resolvable:$true] %s290_s6 }
  0x11   :  { %v86_v20 = vld [vmem:[#allocation8 + $0x38] sm:$0xff]  ;;  %v85_v22 = vld [vmem:[#allocation8 + $0x30] sm:$0xff]  ;;  %v84_v23 = vld [vmem:[#allocation8 + $0x28] sm:$0xff] }
  0x12   :  { %168 = vmatpush.msra.mxu3 %v93_v11  ;;  %263 = vmatpush.msra.mxu2 %v93_v11  ;;  %v83_v24 = vld [vmem:[#allocation8 + $0x20] sm:$0xff]  ;;  %v82_v26 = vld [vmem:[#allocation8 + $0x18] sm:$0xff]  ;;  %v81_v27 = vld [vmem:[#allocation8 + $0x10] sm:$0xff] }
  0x13   :  { %v80_v30 = vld [vmem:[#allocation8 + $0x8] sm:$0xff]  ;;  %v79_v31 = vld [vmem:[#allocation8] sm:$0xff]  ;;  %v95_v36 = vld [vmem:[%s473_s3] sm:$0x1] }
  0x14   :  { %169 = vmatpush.msra.mxu3 %v92_v12  ;;  %264 = vmatpush.msra.mxu2 %v92_v12 }
  0x15   :  { %v96_v2 = vld [vmem:[#allocation2] sm:$0xf]  ;;  %v190_v3 = vld [vmem:[#allocation2] sm:$0xf0] }
  0x16   :  { %113 = vmatpush.xpose.msra.mxu0 %v96_v2  ;;  %v97_v4 = vld [vmem:[#allocation2 + $0x8] sm:$0xf]  ;;  %v194_v5 = vrot.slane %v190_v3, 4  ;;  %v191_v6 = vld [vmem:[#allocation2 + $0x8] sm:$0xf0]  ;;  %170 = vmatpush.msra.mxu3 %v91_v13 }
  0x17   :  { %133 = vmatpush.xpose.msra.mxu1 %v97_v4  ;;  %v195_v7 = vrot.slane %v191_v6, 4  ;;  %265 = vmatpush.msra.mxu2 %v91_v13 }
  0x18   :  { %171 = vmatpush.msra.mxu3 %v90_v14 }
  0x19   :  { %114 = vmatmul.f32.vlgmr.msra.gmra.mxu0 %v426_v8  ;;  %266 = vmatpush.msra.mxu2 %v90_v14 }
  0x1a   :  { %213 = vmatpush.xpose.msrb.mxu0 %v194_v5  ;;  %134 = vmatmul.f32.vlgmr.msra.gmra.mxu1 %v426_v8 }
  0x1b   :  { %303 = vmatpush.msk.msrb.mxu1 %vm142_vm0, %v78_v9  ;;  %172 = vmatpush.msra.mxu3 %v89_v15 }
  0x1c   :  { %267 = vmatpush.msra.mxu2 %v89_v15 }
  0x1d   :  { %305 = vmatpush.msk.msra.mxu1 %vm142_vm0, %v78_v9  ;;  %173 = vmatpush.msra.mxu3 %v88_v16 }
  0x1e   :  { %233 = vmatpush.xpose.msra.mxu0 %v195_v7  ;;  %268 = vmatpush.msra.mxu2 %v88_v16 }
  0x1f   :  { %174 = vmatpush.msra.mxu3 %v87_v17 }
  0x20   :  { %269 = vmatpush.msra.mxu2 %v87_v17 }
  0x21   :  { %214 = vmatmul.f32.vlgmr.msrb.gmra.mxu0 %v426_v8  ;;  %175 = vmatpush.msra.mxu3 %v86_v20 }
  0x22   :  { %270 = vmatpush.msra.mxu2 %v86_v20 }
  0x23   :  { %176 = vmatpush.msra.mxu3 %v85_v22 }
  0x24   :  { %271 = vmatpush.msra.mxu2 %v85_v22 }
  0x25   :  { %177 = vmatpush.msra.mxu3 %v84_v23 }
  0x26   :  { %272 = vmatpush.msra.mxu2 %v84_v23 }
  0x27   :  { %178 = vmatpush.msra.mxu3 %v83_v24 }
  0x28   :  { %273 = vmatpush.msra.mxu2 %v83_v24 }
  0x29   :  { %234 = vmatmul.f32.vlgmr.msra.gmra.mxu0 %v426_v8  ;;  %179 = vmatpush.msra.mxu3 %v82_v26 }
  0x2a   :  { %274 = vmatpush.msra.mxu2 %v82_v26 }
  0x2b   :  { %180 = vmatpush.msra.mxu3 %v81_v27 }
  0x2c   :  { %275 = vmatpush.msra.mxu2 %v81_v27 }
  0x2d   :  { %181 = vmatpush.msra.mxu3 %v80_v30 }
  0x2e   :  { %276 = vmatpush.msra.mxu2 %v80_v30 }
  0x2f   :  { %182 = vmatpush.msra.mxu3 %v79_v31 }
  0x30   :  { %277 = vmatpush.msra.mxu2 %v79_v31 }
  0x96   :  { %v115_v18 = vpop.f32.mrf.mxu0 }
  0x97   :  { %v135_v19 = vpop.f32.mrf.mxu1 }
  0x98   :  { %v136_v21 = vadd.f32 %v135_v19, %v115_v18 }
  0x9a   :  { %304 = vmatmul.msk.f32.vlgmr.msrb.gmra.mxu1 %vm138_vm1, %v136_v21 }
  0x9e   :  { %v215_v25 = vpop.f32.mrf.mxu0 }
  0xa6   :  { %v235_v28 = vpop.f32.mrf.mxu0 }
  0xa7   :  { %v236_v29 = vadd.f32 %v235_v28, %v215_v25 }
  0xa9   :  { %306 = vmatmul.msk.f32.vlgmr.msra.gmra.mxu1 %vm138_vm1, %v236_v29 }
 0x117   :  { %v163_v32 = vpop.f32.mrf.mxu1 }
 0x118   :  { %v166_v33 = vmax.f32 %v163_v32, 0.0 }
 0x11a   :  { %183 = vmatmul.f32.vlgmr.msra.gmra.mxu3 %v166_v33 }
 0x126   :  { %v258_v34 = vpop.f32.mrf.mxu1 }
 0x127   :  { %v261_v35 = vmax.f32 %v258_v34, 0.0 }
 0x129   :  { %278 = vmatmul.f32.vlgmr.msra.gmra.mxu2 %v261_v35 }
 0x19d   :  { %v184_v37 = vpop.f32.mrf.mxu3 }
 0x19e   :  { %v185_v38 = vadd.f32 %v184_v37, %v95_v36 }
 0x1a0   :  { %315 = vtanh.f32 %v185_v38 }
 0x1a6   :  { %v316_v39 = vpop.eup %315 }
 0x1a7   :  { %v188_v40 = vmax.f32 %v316_v39, 0.0 }
 0x1a9   :  { %189 = vst [vmem:[#allocation9] sm:$0x1] %v188_v40 }
 0x1ac   :  { %v279_v41 = vpop.f32.mrf.mxu2 }
 0x1ad   :  { %v280_v42 = vadd.f32 %v279_v41, %v95_v36 }
 0x1af   :  { %317 = vtanh.f32 %v280_v42 }
 0x1b5   :  { %v318_v43 = vpop.eup %317 }
 0x1b6   :  { %v283_v44 = vmax.f32 %v318_v43, 0.0 }
 0x1b8   :  { %284 = vst [vmem:[#allocation9 + $0x1] sm:$0x1] %v283_v44 }
 0x1b9   :  { %295 = dma.vmem_to_hbm [thread:$0]  %s291_s6, 32, %s293_s9, [#allocation5]  }
 0x1ba   :  { %419 = dma.done.wait [#allocation5], 32  }
 0x1bb   :  { %420 = vsyncadd [#allocation5], 4294967264 }
 0x1bc   :  { %300 = vsyncpa [#allocation4], 1 }
 0x1bd   :  { %301 = vsyncpa [#allocation7], 1 }
 0x1be   :  { %302 = vsyncpa [#allocation5], 1 }

</bundles_post_ra>
